<compile_context>
chip_gen: v7x
topology: tpu7x:2x2x1
jax: 0.10.0
libtpu: 0.0.40
codegen_flags: <defaults>
</compile_context>

<pallas_src>
import numpy as np
import jax
import jax.numpy as jnp
from jax.experimental import pallas as pl
from jax.experimental.pallas import tpu as pltpu

LANE = 128
# ~2 MiB per tile. With input + output each double-buffered (~4x tile bytes
# ~= 8 MiB of scoped VMEM) this is safe on v5e (16 MiB default), v6e (32 MiB)
# and v7x (64 MiB physical) while being large enough to run near the HBM
# roofline on all three generations.
_TARGET_TILE_BYTES = 2 * 1024 * 1024


def _copy_kernel(x_ref, o_ref):
    # Straight VMEM tile copy — the entire flatten "hot path".
    o_ref[...] = x_ref[...]


def _choose_lane_width(aligned_total):
    """Widest lane-dense last dim (multiple of 128) that divides the prefix."""
    for cand in (4096, 2048, 1024, 512, 256, 128):
        if aligned_total % cand == 0:
            return cand
    return LANE  # unreachable: aligned_total is a multiple of 128


def _tiled_copy_2d(x2):
    """Lane-dense, pipelined HBM->HBM copy of a (rows, W) slab through VMEM."""
    rows, W = x2.shape
    itemsize = np.dtype(x2.dtype).itemsize

    # Largest sublane count that keeps the tile at ~_TARGET_TILE_BYTES.
    max_tile_rows = max(1, _TARGET_TILE_BYTES // (W * itemsize))
    tile_rows = min(rows, max_tile_rows)
    if rows >= 8:
        # Keep the sublane dim a multiple of 32 when possible (native for
        # f32/bf16/int8/fp8 tilings -> no relayouts), else a multiple of 8.
        if tile_rows >= 32:
            tile_rows = (tile_rows // 32) * 32
        else:
            tile_rows = max(8, (tile_rows // 8) * 8)
    # else: rows < 8 -> tile_rows == rows (full array dim), which is legal.

    grid = pl.cdiv(rows, tile_rows)  # partial last block is masked by Pallas
    nbytes = rows * W * itemsize

    return pl.pallas_call(
        _copy_kernel,
        out_shape=jax.ShapeDtypeStruct((rows, W), x2.dtype),
        grid=(grid,),
        in_specs=[pl.BlockSpec((tile_rows, W), lambda i: (i, 0))],
        out_specs=pl.BlockSpec((tile_rows, W), lambda i: (i, 0)),
        # Flatten is a pure copy: let XLA alias/donate the buffer when it can.
        input_output_aliases={0: 0},
        compiler_params=pltpu.CompilerParams(
            dimension_semantics=("parallel",)),  # shards over v7x's 2 TCs
        cost_estimate=pl.CostEstimate(
            flops=0, transcendentals=0, bytes_accessed=2 * nbytes),
    )(x2)


def flatten_pallas(x, start_dim=0, end_dim=-1):
    """torch.flatten(x, start_dim, end_dim) semantics; copy done in Pallas."""
    if x.ndim == 0:
        x = jnp.reshape(x, (1,))
    nd = x.ndim
    sd = start_dim % nd
    ed = end_dim % nd
    assert sd <= ed, "start_dim must be <= end_dim"
    merged = int(np.prod(x.shape[sd:ed + 1]))
    new_shape = tuple(x.shape[:sd]) + (merged,) + tuple(x.shape[ed + 1:])

    total = int(np.prod(x.shape))
    if total == 0:
        return jnp.reshape(x, new_shape)

    # Metadata reshape — same row-major element order as PyTorch (glue only).
    flat = jnp.reshape(x, (total,))

    aligned = (total // LANE) * LANE   # lane-aligned prefix (fast tiled path)
    tail = total - aligned             # < 128 leftover elements

    pieces = []
    if aligned:
        W = _choose_lane_width(aligned)
        prefix = _tiled_copy_2d(flat[:aligned].reshape(aligned // W, W))
        pieces.append(prefix.reshape(aligned))
    if tail:
        # Tiny (<128-elem) tail: single full-block copy, trivially fits VMEM.
        tail_out = pl.pallas_call(
            _copy_kernel,
            out_shape=jax.ShapeDtypeStruct((1, tail), flat.dtype),
        )(flat[aligned:].reshape(1, tail))
        pieces.append(tail_out.reshape(tail))

    out_flat = pieces[0] if len(pieces) == 1 else jnp.concatenate(pieces)
    return out_flat.reshape(new_shape)


if __name__ == "__main__":
    key = jax.random.PRNGKey(0)

    # Primary check: small NCHW input consistent with the module's usage.
    x = jax.random.normal(key, (2, 4, 16, 16), dtype=jnp.float32)
    y = flatten_pallas(x, start_dim=0, end_dim=-1)
    y = jax.block_until_ready(y)
    ref = x.reshape(-1)
    assert y.shape == ref.shape and y.dtype == ref.dtype
    np.testing.assert_array_equal(np.asarray(y), np.asarray(ref))

    # Extra checks: masked partial-last-block path and tiny non-aligned tail.
    x2 = jax.random.normal(key, (2, 4, 16, 18), dtype=jnp.float32)  # 2304 elems
    y2 = jax.block_until_ready(flatten_pallas(x2, 0, -1))
    np.testing.assert_array_equal(np.asarray(y2), np.asarray(x2.reshape(-1)))

    x3 = jax.random.normal(key, (3, 5, 7), dtype=jnp.float32)       # 105 elems
    y3 = jax.block_until_ready(flatten_pallas(x3, 0, -1))
    np.testing.assert_array_equal(np.asarray(y3), np.asarray(x3.reshape(-1)))

    print("KERNEL_OK")
</pallas_src>

<mosaic_0001>
module attributes {stable_mosaic.version = 11 : i64} {
  func.func @_copy_kernel(%arg0: i32, %arg1: memref<1x2048xf32, #tpu.memory_space<vmem>>, %arg2: memref<1x2048xf32, #tpu.memory_space<vmem>>) attributes {dimension_semantics = [#tpu.dimension_semantics<parallel>], iteration_bounds = array<i64: 1>, scalar_prefetch = 0 : i64, scratch_operands = 0 : i64, tpu.core_type = #tpu.core_type<tc>, window_params = [{transform_indices = @transform_0, window_bounds = array<i64: 1, 2048>}, {transform_indices = @transform_1, window_bounds = array<i64: 1, 2048>}]} {
    %c0 = arith.constant 0 : index
    %c0_0 = arith.constant 0 : index
    %0 = vector.load %arg1[%c0, %c0_0] : memref<1x2048xf32, #tpu.memory_space<vmem>>, vector<1x2048xf32>
    %c0_1 = arith.constant 0 : index
    %c0_2 = arith.constant 0 : index
    %1 = vector.load %arg2[%c0_1, %c0_2] : memref<1x2048xf32, #tpu.memory_space<vmem>>, vector<1x2048xf32>
    tpu.vector_store %arg2[%c0_1, %c0_2], %0 {strides = array<i32>} : memref<1x2048xf32, #tpu.memory_space<vmem>>, vector<1x2048xf32>,
    return
  }
  func.func @transform_0(%arg0: i32) -> (i32, i32) {
    %c0_i32 = arith.constant 0 : i32
    %c0_i32_0 = arith.constant 0 : i32
    return %arg0, %c0_i32 : i32, i32
  }
  func.func @transform_1(%arg0: i32) -> (i32, i32) {
    %c0_i32 = arith.constant 0 : i32
    %c0_i32_0 = arith.constant 0 : i32
    return %arg0, %c0_i32 : i32, i32
  }
}

</mosaic_0001>

<bundles_post_ra>
// kernel: tpu_custom_call.1
= control target key start
LH: loop header
LB: loop body
LE: loop exit
PB: predicated region body
PF: predicated region fallthrough
CT: control target
= control target key end

     0   :  { %6 = vsyncpa [#allocation3], 0  ;;  %s126_s0 = inlined_call_operand.hbm [shape: f32[1,2048], index: 0, kind: input, shape index: {}, may-alias: {0,1}]   ;;  %s127_s1 = inlined_call_operand.hbm [shape: f32[1,2048], index: 1, kind: output, shape index: {}, may-alias: {0,1}]  }
   0x1   :  { %7 = vsyncpa [#allocation4], 0  ;;  %s90_s6 = smov [#allocation2]   ;;  %s42_s10 = scalar_lea.hbm %s126_s0, 256 }
   0x2   :  { %s14_s7 = sshll.u32 %s90_s6, 4  ;;  %p43_p0 = scmp.ne.s32.totalorder %s126_s0, %s42_s10  ;;  %s15_s7 = int_to_ptr.vmem [resolvable:$true] %s14_s7 }
   0x3   :  { %p46_p1 = scmp.lt.u32.totalorder %s42_s10, %s126_s0 }
   0x5   :  { %p48_p2 = pnand %p46_p1, %p43_p0 }
   0x7   :  { %51 = shalt.err (!%p48_p2)
}
   0x8   :  { %s52_s15 = scalar_lea.vmem %s15_s7, 256  ;;  %p57_p4 = scmp.lt.s32.totalorder %s15_s7, %s15_s7 }
   0x9   :  { %p53_p3 = scmp.ne.s32.totalorder %s15_s7, %s52_s15  ;;  %p58_p5 = scmp.lt.s32.totalorder %s52_s15, %s52_s15 }
   0xb   :  { %p59_p6 = por %p58_p5, %p57_p4 }
   0xd   :  { %p60_p7 = pnand %p59_p6, %p53_p3 }
   0xf   :  { %63 = shalt.err (!%p60_p7)
}
  0x10   :  { %17 = dma.hbm_to_vmem [thread:$0]  %s126_s0, 256, %s15_s7, [#allocation3]  }
  0x11   :  { %86 = dma.done.wait [#allocation3], 256  }
  0x12   :  { %87 = vsyncadd [#allocation3], 4294967040  ;;  %s91_s18 = smov [#allocation5]   ;;  %v21_v0 = vld [vmem:[#allocation2] sm:$0xff]  ;;  %v22_v1 = vld [vmem:[#allocation2 + $0x8] sm:$0xff] }
  0x13   :  { %s31_s19 = sshll.u32 %s91_s18, 4  ;;  %23 = vst [vmem:[#allocation5] sm:$0xff] %v21_v0  ;;  %24 = vst [vmem:[#allocation5 + $0x8] sm:$0xff] %v22_v1  ;;  %s32_s19 = int_to_ptr.vmem [resolvable:$true] %s31_s19 }
  0x14   :  { %s64_s20 = scalar_lea.vmem %s32_s19, 256  ;;  %p69_p9 = scmp.lt.s32.totalorder %s32_s19, %s32_s19 }
  0x15   :  { %p65_p8 = scmp.ne.s32.totalorder %s32_s19, %s64_s20  ;;  %p70_p10 = scmp.lt.s32.totalorder %s64_s20, %s64_s20 }
  0x17   :  { %p71_p11 = por %p70_p10, %p69_p9 }
  0x19   :  { %p72_p12 = pnand %p71_p11, %p65_p8 }
  0x1b   :  { %75 = shalt.err (!%p72_p12)
}
  0x1c   :  { %s76_s0 = scalar_lea.hbm %s127_s1, 256 }
  0x1d   :  { %p77_p13 = scmp.ne.s32.totalorder %s127_s1, %s76_s0  ;;  %p80_p0 = scmp.lt.u32.totalorder %s76_s0, %s127_s1 }
  0x1f   :  { %p82_p1 = pnand %p80_p0, %p77_p13 }
  0x21   :  { %85 = shalt.err (!%p82_p1)
}
  0x22   :  { %34 = dma.vmem_to_hbm [thread:$0]  %s32_s19, 256, %s127_s1, [#allocation4]  }
  0x23   :  { %88 = dma.done.wait [#allocation4], 256  }
  0x24   :  { %89 = vsyncadd [#allocation4], 4294967040 }
  0x25   :  { %38 = vsyncpa [#allocation3], 1 }
  0x26   :  { %39 = vsyncpa [#allocation4], 1 }

</bundles_post_ra>
